<compile_context>
chip_gen: v6e
topology: v6e:2x2x1
jax: 0.10.0
libtpu: 0.0.40
codegen_flags: <defaults>
</compile_context>

<pallas_src>
import jax
import jax.numpy as jnp
from jax.experimental import pallas as pl
from jax.experimental.pallas import tpu as pltpu

LANE = 128


def _hardswish(x):
    # HardSwish from the module: relu6(x + 3) / 6 * x
    return jnp.clip(x + 3.0, 0.0, 6.0) * (1.0 / 6.0) * x


def actor_forward_kernel(s_ref, w1_ref, b1_ref, w2_ref, b2_ref, w3_ref, b3_ref, o_ref):
    # One batch tile per grid step: three chained MXU matmuls with VPU
    # hard-swish in between; intermediates stay in vregs/VMEM.
    x = s_ref[...]
    h1 = _hardswish(jnp.dot(x, w1_ref[...], preferred_element_type=jnp.float32) + b1_ref[...])
    h2 = _hardswish(jnp.dot(h1, w2_ref[...], preferred_element_type=jnp.float32) + b2_ref[...])
    out = jnp.dot(h2, w3_ref[...], preferred_element_type=jnp.float32) + b3_ref[...]
    o_ref[...] = out.astype(o_ref.dtype)


def actor_critic_forward(s, params, *, batch_tile=512):
    """ActorCritic.forward(s): a_mean = actor_fc(s)."""
    w1, b1, w2, b2, w3, b3 = params
    batch, action_dim = s.shape
    mid_dim = w1.shape[1]
    critic_dim = w3.shape[1]

    # --- lane-dense output: pad final output features up to a multiple of 128.
    out_pad = max(LANE, pl.cdiv(critic_dim, LANE) * LANE)
    w3p = jnp.zeros((mid_dim, out_pad), w3.dtype).at[:, :critic_dim].set(w3)
    b3p = jnp.zeros((1, out_pad), b3.dtype).at[:, :critic_dim].set(b3)

    # --- batch grid: large row tile (sublane-aligned), pad batch to a multiple.
    tile_b = min(batch_tile, batch)
    if tile_b != batch:
        tile_b = max(8, (tile_b // 8) * 8)
    batch_pad = pl.cdiv(batch, tile_b) * tile_b
    if batch_pad != batch:
        s_in = jnp.zeros((batch_pad, action_dim), s.dtype).at[:batch].set(s)
    else:
        s_in = s
    grid = (batch_pad // tile_b,)

    # Weights/biases: full-array blocks, constant block index -> resident in
    # VMEM across the whole grid (no per-iteration re-DMA / re-broadcast).
    def full_spec(shape):
        return pl.BlockSpec(shape, lambda i: (0, 0))

    flops = 2 * batch_pad * (action_dim * mid_dim + mid_dim * mid_dim + mid_dim * out_pad)
    bytes_accessed = 4 * (
        s_in.size + w1.size + b1.size + w2.size + b2.size + w3p.size + b3p.size
        + batch_pad * out_pad
    )

    out = pl.pallas_call(
        actor_forward_kernel,
        out_shape=jax.ShapeDtypeStruct((batch_pad, out_pad), jnp.float32),
        grid_spec=pltpu.PrefetchScalarGridSpec(
            num_scalar_prefetch=0,
            grid=grid,
            in_specs=[
                pl.BlockSpec((tile_b, action_dim), lambda i: (i, 0)),  # s
                full_spec(w1.shape), full_spec(b1.shape),
                full_spec(w2.shape), full_spec(b2.shape),
                full_spec(w3p.shape), full_spec(b3p.shape),
            ],
            out_specs=pl.BlockSpec((tile_b, out_pad), lambda i: (i, 0)),
        ),
        compiler_params=pltpu.CompilerParams(
            dimension_semantics=("parallel",),
        ),
        cost_estimate=pl.CostEstimate(
            flops=flops, transcendentals=0, bytes_accessed=bytes_accessed),
    )(s_in, w1, b1, w2, b2, w3p, b3p)

    # Slice back to the real batch / actor output width.
    return out[:batch, :critic_dim]


def init_params(key, action_dim, critic_dim, mid_dim):
    """Deterministic synthetic init (shapes match the PyTorch Linear layers).

    Weights are stored as [in, out] (transposed vs torch's [out, in])."""
    ks = jax.random.split(key, 3)
    scale = 0.1
    w1 = scale * jax.random.normal(ks[0], (action_dim, mid_dim), jnp.float32)
    b1 = jnp.zeros((1, mid_dim), jnp.float32)
    w2 = scale * jax.random.normal(ks[1], (mid_dim, mid_dim), jnp.float32)
    b2 = jnp.zeros((1, mid_dim), jnp.float32)
    w3 = 0.01 * jax.random.normal(ks[2], (mid_dim, critic_dim), jnp.float32)
    b3 = jnp.zeros((1, critic_dim), jnp.float32)
    # actor_logstd exists in __init__ but is unused by forward(); omitted here.
    return (w1, b1, w2, b2, w3, b3)


def _reference_forward(s, params):
    w1, b1, w2, b2, w3, b3 = params
    h1 = _hardswish(s @ w1 + b1)
    h2 = _hardswish(h1 @ w2 + b2)
    return h2 @ w3 + b3


if __name__ == "__main__":
    key = jax.random.PRNGKey(0)
    k_s, k_p, k_big = jax.random.split(key, 3)

    batch, action_dim, critic_dim, mid_dim = 8, 16, 4, 32
    s = jax.random.normal(k_s, (batch, action_dim), jnp.float32)
    params = init_params(k_p, action_dim, critic_dim, mid_dim)

    a_mean = actor_critic_forward(s, params)
    jax.block_until_ready(a_mean)

    ref = _reference_forward(s, params)
    assert a_mean.shape == (batch, critic_dim)
    assert jnp.allclose(a_mean, ref, atol=1e-4, rtol=1e-4)

    # Exercise the batch grid + padding path (non-multiple of the tile).
    big_batch = 1000
    s_big = jax.random.normal(k_big, (big_batch, action_dim), jnp.float32)
    a_big = actor_critic_forward(s_big, params, batch_tile=256)
    jax.block_until_ready(a_big)
    ref_big = _reference_forward(s_big, params)
    assert a_big.shape == (big_batch, critic_dim)
    assert jnp.allclose(a_big, ref_big, atol=1e-4, rtol=1e-4)

    print("KERNEL_OK")
</pallas_src>

<mosaic_0001>
module attributes {stable_mosaic.version = 11 : i64} {
  func.func @actor_forward_kernel(%arg0: i32, %arg1: memref<8x16xf32, #tpu.memory_space<vmem>>, %arg2: memref<16x32xf32, #tpu.memory_space<vmem>>, %arg3: memref<1x32xf32, #tpu.memory_space<vmem>>, %arg4: memref<32x32xf32, #tpu.memory_space<vmem>>, %arg5: memref<1x32xf32, #tpu.memory_space<vmem>>, %arg6: memref<32x128xf32, #tpu.memory_space<vmem>>, %arg7: memref<1x128xf32, #tpu.memory_space<vmem>>, %arg8: memref<8x128xf32, #tpu.memory_space<vmem>>) attributes {dimension_semantics = [#tpu.dimension_semantics<parallel>], iteration_bounds = array<i64: 1>, scalar_prefetch = 0 : i64, scratch_operands = 0 : i64, tpu.core_type = #tpu.core_type<tc>, window_params = [{transform_indices = @transform_0, window_bounds = array<i64: 8, 16>}, {pipeline_mode = #tpu.pipeline_mode<synchronous>, transform_indices = @transform_1, window_bounds = array<i64: 16, 32>}, {pipeline_mode = #tpu.pipeline_mode<synchronous>, transform_indices = @transform_2, window_bounds = array<i64: 1, 32>}, {pipeline_mode = #tpu.pipeline_mode<synchronous>, transform_indices = @transform_3, window_bounds = array<i64: 32, 32>}, {pipeline_mode = #tpu.pipeline_mode<synchronous>, transform_indices = @transform_4, window_bounds = array<i64: 1, 32>}, {pipeline_mode = #tpu.pipeline_mode<synchronous>, transform_indices = @transform_5, window_bounds = array<i64: 32, 128>}, {pipeline_mode = #tpu.pipeline_mode<synchronous>, transform_indices = @transform_6, window_bounds = array<i64: 1, 128>}, {transform_indices = @transform_7, window_bounds = array<i64: 8, 128>}]} {
    %c0 = arith.constant 0 : index
    %c0_0 = arith.constant 0 : index
    %0 = vector.load %arg1[%c0, %c0_0] : memref<8x16xf32, #tpu.memory_space<vmem>>, vector<8x16xf32>
    %c0_1 = arith.constant 0 : index
    %c0_2 = arith.constant 0 : index
    %1 = vector.load %arg2[%c0_1, %c0_2] : memref<16x32xf32, #tpu.memory_space<vmem>>, vector<16x32xf32>
    %cst = arith.constant dense<0.000000e+00> : vector<8x32xf32>
    %2 = tpu.matmul %0, %1, %cst {dimension_numbers = #tpu.dot_dimension_numbers<[1], [0], [0], [1], [0, 0, 1, 1], [], []>} : vector<8x16xf32>, vector<16x32xf32>, vector<8x32xf32> -> vector<8x32xf32>
    %c0_3 = arith.constant 0 : index
    %c0_4 = arith.constant 0 : index
    %3 = vector.load %arg3[%c0_3, %c0_4] : memref<1x32xf32, #tpu.memory_space<vmem>>, vector<1x32xf32>
    %4 = vector.broadcast %3 : vector<1x32xf32> to vector<8x32xf32>
    %5 = arith.addf %2, %4 : vector<8x32xf32>
    %cst_5 = arith.constant 3.000000e+00 : f32
    %6 = vector.broadcast %cst_5 : f32 to vector<8x32xf32>
    %7 = arith.addf %5, %6 : vector<8x32xf32>
    %cst_6 = arith.constant 0.000000e+00 : f32
    %cst_7 = arith.constant 6.000000e+00 : f32
    %8 = vector.broadcast %cst_6 : f32 to vector<8x32xf32>
    %9 = arith.maximumf %8, %7 : vector<8x32xf32>
    %10 = vector.broadcast %cst_7 : f32 to vector<8x32xf32>
    %11 = arith.minimumf %10, %9 : vector<8x32xf32>
    %cst_8 = arith.constant 0.166666672 : f32
    %12 = vector.broadcast %cst_8 : f32 to vector<8x32xf32>
    %13 = arith.mulf %11, %12 : vector<8x32xf32>
    %14 = arith.mulf %13, %5 : vector<8x32xf32>
    %c0_9 = arith.constant 0 : index
    %c0_10 = arith.constant 0 : index
    %15 = vector.load %arg4[%c0_9, %c0_10] : memref<32x32xf32, #tpu.memory_space<vmem>>, vector<32x32xf32>
    %cst_11 = arith.constant dense<0.000000e+00> : vector<8x32xf32>
    %16 = tpu.matmul %14, %15, %cst_11 {dimension_numbers = #tpu.dot_dimension_numbers<[1], [0], [0], [1], [0, 0, 1, 1], [], []>} : vector<8x32xf32>, vector<32x32xf32>, vector<8x32xf32> -> vector<8x32xf32>
    %c0_12 = arith.constant 0 : index
    %c0_13 = arith.constant 0 : index
    %17 = vector.load %arg5[%c0_12, %c0_13] : memref<1x32xf32, #tpu.memory_space<vmem>>, vector<1x32xf32>
    %18 = vector.broadcast %17 : vector<1x32xf32> to vector<8x32xf32>
    %19 = arith.addf %16, %18 : vector<8x32xf32>
    %cst_14 = arith.constant 3.000000e+00 : f32
    %20 = vector.broadcast %cst_14 : f32 to vector<8x32xf32>
    %21 = arith.addf %19, %20 : vector<8x32xf32>
    %cst_15 = arith.constant 0.000000e+00 : f32
    %cst_16 = arith.constant 6.000000e+00 : f32
    %22 = vector.broadcast %cst_15 : f32 to vector<8x32xf32>
    %23 = arith.maximumf %22, %21 : vector<8x32xf32>
    %24 = vector.broadcast %cst_16 : f32 to vector<8x32xf32>
    %25 = arith.minimumf %24, %23 : vector<8x32xf32>
    %cst_17 = arith.constant 0.166666672 : f32
    %26 = vector.broadcast %cst_17 : f32 to vector<8x32xf32>
    %27 = arith.mulf %25, %26 : vector<8x32xf32>
    %28 = arith.mulf %27, %19 : vector<8x32xf32>
    %c0_18 = arith.constant 0 : index
    %c0_19 = arith.constant 0 : index
    %29 = vector.load %arg6[%c0_18, %c0_19] : memref<32x128xf32, #tpu.memory_space<vmem>>, vector<32x128xf32>
    %cst_20 = arith.constant dense<0.000000e+00> : vector<8x128xf32>
    %30 = tpu.matmul %28, %29, %cst_20 {dimension_numbers = #tpu.dot_dimension_numbers<[1], [0], [0], [1], [0, 0, 1, 1], [], []>} : vector<8x32xf32>, vector<32x128xf32>, vector<8x128xf32> -> vector<8x128xf32>
    %c0_21 = arith.constant 0 : index
    %c0_22 = arith.constant 0 : index
    %31 = vector.load %arg7[%c0_21, %c0_22] : memref<1x128xf32, #tpu.memory_space<vmem>>, vector<1x128xf32>
    %32 = vector.broadcast %31 : vector<1x128xf32> to vector<8x128xf32>
    %33 = arith.addf %30, %32 : vector<8x128xf32>
    %c0_23 = arith.constant 0 : index
    %c0_24 = arith.constant 0 : index
    %34 = vector.load %arg8[%c0_23, %c0_24] : memref<8x128xf32, #tpu.memory_space<vmem>>, vector<8x128xf32>
    tpu.vector_store %arg8[%c0_23, %c0_24], %33 {strides = array<i32>} : memref<8x128xf32, #tpu.memory_space<vmem>>, vector<8x128xf32>,
    return
  }
  func.func @transform_0(%arg0: i32) -> (i32, i32) {
    %c0_i32 = arith.constant 0 : i32
    %c0_i32_0 = arith.constant 0 : i32
    return %arg0, %c0_i32 : i32, i32
  }
  func.func @transform_1(%arg0: i32) -> (i32, i32) {
    %c0_i32 = arith.constant 0 : i32
    %c0_i32_0 = arith.constant 0 : i32
    %c0_i32_1 = arith.constant 0 : i32
    return %c0_i32, %c0_i32_0 : i32, i32
  }
  func.func @transform_2(%arg0: i32) -> (i32, i32) {
    %c0_i32 = arith.constant 0 : i32
    %c0_i32_0 = arith.constant 0 : i32
    %c0_i32_1 = arith.constant 0 : i32
    return %c0_i32, %c0_i32_0 : i32, i32
  }
  func.func @transform_3(%arg0: i32) -> (i32, i32) {
    %c0_i32 = arith.constant 0 : i32
    %c0_i32_0 = arith.constant 0 : i32
    %c0_i32_1 = arith.constant 0 : i32
    return %c0_i32, %c0_i32_0 : i32, i32
  }
  func.func @transform_4(%arg0: i32) -> (i32, i32) {
    %c0_i32 = arith.constant 0 : i32
    %c0_i32_0 = arith.constant 0 : i32
    %c0_i32_1 = arith.constant 0 : i32
    return %c0_i32, %c0_i32_0 : i32, i32
  }
  func.func @transform_5(%arg0: i32) -> (i32, i32) {
    %c0_i32 = arith.constant 0 : i32
    %c0_i32_0 = arith.constant 0 : i32
    %c0_i32_1 = arith.constant 0 : i32
    return %c0_i32, %c0_i32_0 : i32, i32
  }
  func.func @transform_6(%arg0: i32) -> (i32, i32) {
    %c0_i32 = arith.constant 0 : i32
    %c0_i32_0 = arith.constant 0 : i32
    %c0_i32_1 = arith.constant 0 : i32
    return %c0_i32, %c0_i32_0 : i32, i32
  }
  func.func @transform_7(%arg0: i32) -> (i32, i32) {
    %c0_i32 = arith.constant 0 : i32
    %c0_i32_0 = arith.constant 0 : i32
    return %arg0, %c0_i32 : i32, i32
  }
}

</mosaic_0001>

<bundles_post_ra>
// kernel: tpu_custom_call.1
= control target key start
LH: loop header
LB: loop body
LE: loop exit
PB: predicated region body
PF: predicated region fallthrough
CT: control target
= control target key end

     0   :  { %12 = vsyncpa [#allocation3], 0  ;;  %s610_s0 = inlined_call_operand.hbm [shape: f32[8,16], index: 0, kind: input, shape index: {}]   ;;  %s611_s1 = inlined_call_operand.hbm [shape: f32[16,32], index: 1, kind: input, shape index: {}]   ;;  %s612_s2 = inlined_call_operand.vmem [shape: f32[1,32], index: 2, kind: input, shape index: {}]   ;;  %s613_s3 = inlined_call_operand.hbm [shape: f32[32,32], index: 3, kind: input, shape index: {}]   ;;  %s614_s4 = inlined_call_operand.vmem [shape: f32[1,32], index: 4, kind: input, shape index: {}]   ;;  %s615_s5 = inlined_call_operand.hbm [shape: f32[32,128], index: 5, kind: input, shape index: {}]   ;;  %s616_s6 = inlined_call_operand.vmem [shape: f32[1,128], index: 6, kind: input, shape index: {}]   ;;  %s617_s7 = inlined_call_operand.hbm [shape: f32[8,128], index: 7, kind: output, shape index: {}]  }
   0x1   :  { %13 = vsyncpa [#allocation6], 0 }
   0x2   :  { %14 = vsyncpa [#allocation9], 0 }
   0x3   :  { %15 = vsyncpa [#allocation4], 0  ;;  %s526_s24 = smov [#allocation5]  }
   0x4   :  { %s31_s25 = sshll.u32 %s526_s24, 4  ;;  %s32_s25 = int_to_ptr.vmem [resolvable:$true] %s31_s25 }
   0x5   :  { %s426_s26 = scalar_lea.vmem %s32_s25, 256  ;;  %p431_p1 = scmp.lt.s32.totalorder %s32_s25, %s32_s25 }
   0x6   :  { %p427_p0 = scmp.ne.s32.totalorder %s32_s25, %s426_s26  ;;  %p432_p2 = scmp.lt.s32.totalorder %s426_s26, %s426_s26 }
   0x8   :  { %p433_p3 = por %p432_p2, %p431_p1 }
   0xa   :  { %p434_p4 = pnand %p433_p3, %p427_p0 }
   0xc   :  { %437 = shalt.err (!%p434_p4)
}
   0xd   :  { %s527_s27 = smov 128   ;;  %s528_s28 = smov 8  }
   0xe   :  { %37 = dma.hbm_to_vmem [thread:$0]  %s611_s1, 256, %s32_s25, [#allocation6], %s527_s27, %s527_s27, %s528_s28  }
   0xf   :  { %s529_s8 = smov [#allocation2]   ;;  %s530_s10 = smov [#allocation7]  }
  0x10   :  { %s22_s9 = sshll.u32 %s529_s8, 4  ;;  %s45_s11 = sshll.u32 %s530_s10, 4  ;;  %s23_s9 = int_to_ptr.vmem [resolvable:$true] %s22_s9  ;;  %s46_s11 = int_to_ptr.vmem [resolvable:$true] %s45_s11 }
  0x11   :  { %s446_s12 = scalar_lea.vmem %s23_s9, 128  ;;  %p451_p6 = scmp.lt.s32.totalorder %s23_s9, %s23_s9 }
  0x12   :  { %p447_p5 = scmp.ne.s32.totalorder %s23_s9, %s446_s12  ;;  %p452_p7 = scmp.lt.s32.totalorder %s446_s12, %s446_s12 }
  0x14   :  { %p453_p8 = por %p452_p7, %p451_p6 }
  0x16   :  { %p454_p9 = pnand %p453_p8, %p447_p5 }
  0x18   :  { %457 = shalt.err (!%p454_p9)
}
  0x19   :  { %25 = dma.hbm_to_vmem [thread:$0]  %s610_s0, 128, %s23_s9, [#allocation3]  }
  0x1a   :  { %s466_s15 = scalar_lea.vmem %s46_s11, 512  ;;  %p471_p11 = scmp.lt.s32.totalorder %s46_s11, %s46_s11 }
  0x1b   :  { %p467_p10 = scmp.ne.s32.totalorder %s46_s11, %s466_s15  ;;  %p472_p12 = scmp.lt.s32.totalorder %s466_s15, %s466_s15 }
  0x1d   :  { %p473_p13 = por %p472_p12, %p471_p11 }
  0x1f   :  { %p474_p0 = pnand %p473_p13, %p467_p10 }
  0x21   :  { %477 = shalt.err (!%p474_p0)
}
  0x22   :  { %51 = dma.hbm_to_vmem [thread:$0]  %s613_s3, 512, %s46_s11, [#allocation6], %s527_s27, %s527_s27, %s528_s28  }
  0x23   :  { %s531_s17 = smov [#allocation8]  }
  0x24   :  { %s59_s18 = sshll.u32 %s531_s17, 4  ;;  %s60_s18 = int_to_ptr.vmem [resolvable:$true] %s59_s18 }
  0x25   :  { %s486_s19 = scalar_lea.vmem %s60_s18, 512  ;;  %p491_p2 = scmp.lt.s32.totalorder %s60_s18, %s60_s18 }
  0x26   :  { %p487_p1 = scmp.ne.s32.totalorder %s60_s18, %s486_s19  ;;  %p492_p3 = scmp.lt.s32.totalorder %s486_s19, %s486_s19 }
  0x28   :  { %p493_p4 = por %p492_p3, %p491_p2 }
  0x2a   :  { %p494_p5 = pnand %p493_p4, %p487_p1 }
  0x2c   :  { %497 = shalt.err (!%p494_p5)
}
  0x2d   :  { %65 = dma.hbm_to_vmem [thread:$0]  %s615_s5, 512, %s60_s18, [#allocation9], %s527_s27, %s527_s27, %s528_s28  }
  0x2e   :  { %518 = dma.done.wait [#allocation3], 128  }
  0x2f   :  { %519 = vsyncadd [#allocation3], 4294967168 }
  0x30   :  { %520 = dma.done.wait [#allocation6], 768  }
  0x31   :  { %521 = vsyncadd [#allocation6], 4294966528 }
  0x32   :  { %522 = dma.done.wait [#allocation9], 512  }
  0x33   :  { %523 = vsyncadd [#allocation9], 4294966784  ;;  %v532_v0 = vmov 0.0   ;;  %vm533_vm0 = vmmov 0   ;;  %v82_v1 = vld [vmem:[#allocation5 + $0x8] sm:$0xff]  ;;  %v81_v2 = vld [vmem:[#allocation5] sm:$0xff] }
  0x34   :  { %380 = vmatprep.subr.mxu0 %v532_v0  ;;  %384 = vmatprep.mubr.msk.f32.mxu0 %vm533_vm0, %v532_v0  ;;  %v80_v3 = vld [vmem:[#allocation2] sm:$0xff]  ;;  %vm90_vm1 = vcmask 130048   ;;  %v172_v4 = vld [vmem:[#allocation7 + $0x18] sm:$0xff]  ;;  %v171_v5 = vld [vmem:[#allocation7 + $0x10] sm:$0xff]  ;;  %vm180_vm2 = vcmask 261120   ;;  %s534_s24 = smov [#allocation10]  }
  0x35   :  { %387 = vmatprep.subr.mxu1 %v532_v0  ;;  %395 = vmatprep.mubr.msk.f32.mxu1 %vm533_vm0, %v532_v0  ;;  %v170_v6 = vld [vmem:[#allocation7 + $0x8] sm:$0xff]  ;;  %v169_v7 = vld [vmem:[#allocation7] sm:$0xff]  ;;  %v262_v17 = vld [vmem:[#allocation8 + $0x18] sm:$0xff]  ;;  %s350_s25 = sshll.u32 %s534_s24, 4  ;;  %s351_s25 = int_to_ptr.vmem [resolvable:$true] %s350_s25 }
  0x36   :  { %381 = vmatpush3.msra.mxu0 %v82_v1  ;;  %388 = vmatpush3.msra.mxu1 %v172_v4  ;;  %v361_v8 = vld [vmem:[%s612_s2] ss:$0 sm:$0xff]  ;;  %v261_v18 = vld [vmem:[#allocation8 + $0x10] sm:$0xff]  ;;  %v259_v20 = vld [vmem:[#allocation8] sm:$0xff]  ;;  %p503_p7 = scmp.lt.s32.totalorder %s351_s25, %s351_s25 }
  0x37   :  { %382 = vmatprep.subr.mxu0 %v532_v0  ;;  %389 = vmatprep.subr.mxu1 %v532_v0  ;;  %v260_v19 = vld [vmem:[#allocation8 + $0x8] sm:$0xff] }
  0x38   :  { %383 = vmatpush3.msra.mxu0 %v81_v2  ;;  %390 = vmatpush3.msra.mxu1 %v171_v5  ;;  %v363_v21 = vld [vmem:[%s614_s4] ss:$0 sm:$0xff]  ;;  %s498_s4 = scalar_lea.vmem %s351_s25, 128 }
  0x39   :  { %385 = vmatmul.mubr.msk.f32.vlgmr.msra.gmra.mxu0 %vm90_vm1, %v80_v3  ;;  %398 = vmatprep.subr.mxu0 %v532_v0  ;;  %v365_v30 = vld [vmem:[%s616_s6] ss:$0 sm:$0xff]  ;;  %p499_p6 = scmp.ne.s32.totalorder %s351_s25, %s498_s4  ;;  %p504_p8 = scmp.lt.s32.totalorder %s498_s4, %s498_s4 }
  0x3a   :  { %406 = vmatprep.mubr.msk.f32.mxu0 %vm533_vm0, %v532_v0  ;;  %391 = vmatprep.subr.mxu1 %v532_v0 }
  0x3b   :  { %392 = vmatpush3.msra.mxu1 %v170_v6  ;;  %399 = vmatpush3.msra.mxu0 %v262_v17  ;;  %p505_p9 = por %p504_p8, %p503_p7 }
  0x3c   :  { %393 = vmatprep.subr.mxu1 %v532_v0  ;;  %400 = vmatprep.subr.mxu0 %v532_v0 }
  0x3d   :  { %394 = vmatpush3.msra.mxu1 %v169_v7  ;;  %401 = vmatpush3.msra.mxu0 %v261_v18  ;;  %p506_p10 = pnand %p505_p9, %p499_p6 }
  0x3e   :  { %402 = vmatprep.subr.mxu0 %v532_v0 }
  0x3f   :  { %403 = vmatpush3.msra.mxu0 %v260_v19 }
  0x40   :  { %404 = vmatprep.subr.mxu0 %v532_v0 }
  0x41   :  { %405 = vmatpush3.msra.mxu0 %v259_v20 }
  0xf9   :  { %v160_v9 = vpop.f32.mrf.mxu0 }
  0xfa   :  { %v161_v10 = vadd.f32 %v361_v8, %v160_v9 }
  0xfb   :  { %v386_v11 = vpop.f32.mrf.mxu0 }
  0xfc   :  { %v164_v12 = vadd.f32 3.0, %v161_v10 }
  0xfe   :  { %v165_v13 = vmax.f32 %v164_v12, 0.0 }
 0x100   :  { %v166_v14 = vmin.f32 %v165_v13, 6.0 }
 0x102   :  { %v167_v15 = vmul.f32 0.16666667, %v166_v14 }
 0x104   :  { %v168_v16 = vmul.f32 %v167_v15, %v161_v10 }
 0x106   :  { %396 = vmatmul.mubr.msk.f32.vlgmr.msra.gmra.mxu1 %vm180_vm2, %v168_v16 }
 0x1c6   :  { %v250_v22 = vpop.f32.mrf.mxu1 }
 0x1c7   :  { %v251_v23 = vadd.f32 %v363_v21, %v250_v22 }
 0x1c8   :  { %v397_v24 = vpop.f32.mrf.mxu1 }
 0x1c9   :  { %v254_v25 = vadd.f32 3.0, %v251_v23 }
 0x1cb   :  { %v255_v26 = vmax.f32 %v254_v25, 0.0 }
 0x1cd   :  { %v256_v27 = vmin.f32 %v255_v26, 6.0 }
 0x1cf   :  { %v257_v28 = vmul.f32 0.16666667, %v256_v27 }
 0x1d1   :  { %v258_v29 = vmul.f32 %v257_v28, %v251_v23 }
 0x1d3   :  { %407 = vmatmul.mubr.msk.f32.vlgmr.msra.gmra.mxu0 %vm180_vm2, %v258_v29 }
 0x293   :  { %v339_v31 = vpop.f32.mrf.mxu0 }
 0x294   :  { %v340_v32 = vadd.f32 %v365_v30, %v339_v31 }
 0x295   :  { %v408_v33 = vpop.f32.mrf.mxu0 }
 0x296   :  { %343 = vst [vmem:[#allocation10] sm:$0xff] %v340_v32 }
 0x297   :  { %509 = shalt.err (!%p506_p10)
}
 0x298   :  { %353 = dma.vmem_to_hbm [thread:$0]  %s351_s25, 128, %s617_s7, [#allocation4]  }
 0x299   :  { %524 = dma.done.wait [#allocation4], 128  }
 0x29a   :  { %525 = vsyncadd [#allocation4], 4294967168 }
 0x29b   :  { %357 = vsyncpa [#allocation3], 1 }
 0x29c   :  { %358 = vsyncpa [#allocation6], 1 }
 0x29d   :  { %359 = vsyncpa [#allocation9], 1 }
 0x29e   :  { %360 = vsyncpa [#allocation4], 1 }

</bundles_post_ra>
